<compile_context>
chip_gen: v7x
topology: tpu7x:2x2x1
jax: 0.10.0
libtpu: 0.0.40
codegen_flags: <defaults>
</compile_context>

<pallas_src>
import math

import jax
import jax.numpy as jnp
from jax.experimental import pallas as pl
from jax.experimental.pallas import tpu as pltpu

_SQRT_HALF = 1.0 / math.sqrt(2.0)
_TM_CANDS = (1024, 768, 512, 384, 256, 128)   # row-tile candidates (all sublane aligned)


# ----------------------------------------------------------------------------- kernels

def _ffn_resident_kernel(x_ref, w1_ref, b1_ref, w2_ref, b2_ref, o_ref):
    """Single-pass FFN; W1/b1/W2/b2 stay resident in VMEM (constant blocks)."""
    h = jnp.dot(x_ref[...], w1_ref[...], preferred_element_type=jnp.float32)
    h = h + b1_ref[...].astype(jnp.float32)
    # exact (erf-based) GELU, matching torch.nn.functional.gelu default
    h = 0.5 * h * (1.0 + jax.lax.erf(h * _SQRT_HALF))
    # intermediate_dropout -> identity (eval)
    out = jnp.dot(h.astype(w2_ref.dtype), w2_ref[...],
                  preferred_element_type=jnp.float32)
    out = out + b2_ref[...].astype(jnp.float32)
    # output_dropout -> identity (eval)
    o_ref[...] = out.astype(o_ref.dtype)


def _ffn_ktiled_kernel(x_ref, w1_ref, b1_ref, w2_ref, b2_ref, o_ref, acc_ref):
    """k-tiled over the intermediate dimension with an f32 VMEM accumulator."""
    k = pl.program_id(1)

    @pl.when(k == 0)
    def _():
        acc_ref[...] = jnp.zeros_like(acc_ref)

    # intermediate_dense: native-dtype MXU matmul, f32 accumulation.
    h = jnp.dot(x_ref[...], w1_ref[...], preferred_element_type=jnp.float32)
    h = h + b1_ref[...].astype(jnp.float32)
    h = 0.5 * h * (1.0 + jax.lax.erf(h * _SQRT_HALF))
    # intermediate_dropout -> identity (eval)

    # output_dense: partial contraction over this intermediate tile.
    acc_ref[...] += jnp.dot(h.astype(w2_ref.dtype), w2_ref[...],
                            preferred_element_type=jnp.float32)

    @pl.when(k == pl.num_programs(1) - 1)
    def _():
        out = acc_ref[...] + b2_ref[...].astype(jnp.float32)
        # output_dropout -> identity (eval)
        o_ref[...] = out.astype(o_ref.dtype)


# ----------------------------------------------------------------------------- planning

def _round_up(a, b):
    return (a + b - 1) // b * b


def _sublane(dtype):
    # 8 sublanes for 32-bit, 16 for 16-bit, 32 for 8-bit dtypes.
    return max(8, 32 // jnp.dtype(dtype).itemsize)


def _tile_bytes(rows, cols, dtype):
    """VMEM bytes for one buffer holding a (rows, cols) block, with (sublane,128) padding."""
    return (_round_up(max(rows, 1), _sublane(dtype))
            * _round_up(max(cols, 1), 128)
            * jnp.dtype(dtype).itemsize)


def _vmem_budget_bytes():
    """Generation-aware VMEM budget (~75% of physical capacity)."""
    try:
        cap = int(pltpu.get_tpu_info().vmem_capacity_bytes)
    except Exception:
        cap = 64 << 20  # conservative default (v7x per-core VMEM)
    return (cap * 3) // 4   # ~96 MiB on 128 MiB parts, ~48 MiB on v7x


def _spec(block_shape, index_map, *, single_buffer=False):
    """BlockSpec; constant-index blocks request single buffering when supported."""
    if single_buffer:
        try:
            return pl.BlockSpec(block_shape, index_map, pipeline_mode=pl.Buffered(1))
        except Exception:
            pass  # older JAX without pipeline_mode / Buffered(1): fall back
    return pl.BlockSpec(block_shape, index_map)


def _tk_candidates(inter):
    """Intermediate-dim tile candidates (multiples of 128, limited padding waste)."""
    inter128 = _round_up(inter, 128)
    cands = []
    for t in (1024, 512, 256, 128):
        if t > inter128:
            continue
        if _round_up(inter, t) <= max(inter128, int(1.25 * inter)):
            cands.append(t)
    return cands or [128]


def _plan_tiles(M, io, inter, dtype, budget):
    """Returns ("resident", tm, None) or ("ktiled", tm, tk)."""
    tm_cap = max(128, _round_up(M, 128))              # small-M guard: tm >= 128
    tm_cands = [t for t in _TM_CANDS if t <= tm_cap] or [128]

    # --- resident-weights fast path: weights DMA'd from HBM exactly once. -----
    # Counted x2 to stay safe even if single-buffering of constant blocks is not honored.
    w_bytes = 2 * (_tile_bytes(io, inter, dtype) + _tile_bytes(inter, io, dtype)
                   + _tile_bytes(1, inter, dtype) + _tile_bytes(1, io, dtype))
    if w_bytes <= 0.6 * budget:
        for tm in tm_cands:
            per_step = (4 * _tile_bytes(tm, io, dtype)              # x + out (double-buffered)
                        + _tile_bytes(tm, inter, jnp.float32)       # h (f32 intermediate)
                        + _tile_bytes(tm, inter, dtype))            # h cast for 2nd matmul
            if w_bytes + per_step <= budget:
                return ("resident", tm, None)

    # --- k-tiled reduction path: stream W1/W2 k-tiles, f32 accumulator. -------
    for tm in tm_cands:                                # big tm first (arithmetic intensity)
        for tk in _tk_candidates(inter):               # then big tk (fewer acc RMW steps)
            est = (2 * _tile_bytes(tm, io, dtype)       # x tile
                   + 2 * _tile_bytes(io, tk, dtype)     # W1 k-tile
                   + 2 * _tile_bytes(1, tk, dtype)      # b1 k-tile
                   + 2 * _tile_bytes(tk, io, dtype)     # W2 k-tile
                   + 2 * _tile_bytes(1, io, dtype)      # b2 (constant block, conservative)
                   + 2 * _tile_bytes(tm, io, dtype)     # out tile
                   + _tile_bytes(tm, io, jnp.float32)   # f32 accumulator scratch
                   + _tile_bytes(tm, tk, jnp.float32)   # h (f32)
                   + _tile_bytes(tm, tk, dtype))        # h cast
            if est <= budget:
                return ("ktiled", tm, tk)
    return ("ktiled", 128, 128)                         # last-resort minimal tiling


# ----------------------------------------------------------------------------- wrapper

def feed_forward(x, w1, b1, w2, b2):
    """x: (batch, seq, io); w1: (io, inter); b1: (inter,); w2: (inter, io); b2: (io,)."""
    batch, seq, io = x.shape
    inter = w1.shape[1]
    M = batch * seq
    dtype = x.dtype

    # Match weight dtype to activations so bf16 inputs use the native bf16 MXU path
    # and the VMEM plan is consistent.
    w1 = w1.astype(dtype)
    b1 = b1.astype(dtype)
    w2 = w2.astype(dtype)
    b2 = b2.astype(dtype)

    budget = int(_vmem_budget_bytes())
    mode, tm, tk = _plan_tiles(M, io, inter, dtype, budget)

    x2d = x.reshape(M, io)
    # Pad rows so grid[0] = M_pad // tm is even (>= 2): keeps both v7x TensorCores
    # busy on the "parallel" axis. Pad rows are junk and get sliced off below.
    M_pad = _round_up(M, tm)
    if (M_pad // tm) % 2 == 1:
        M_pad += tm
    if M_pad != M:
        x2d = jnp.pad(x2d, ((0, M_pad - M), (0, 0)))

    b1_2d = b1.reshape(1, inter)
    b2_2d = b2.reshape(1, io)

    if mode == "resident":
        out2d = pl.pallas_call(
            _ffn_resident_kernel,
            out_shape=jax.ShapeDtypeStruct((M_pad, io), dtype),
            grid_spec=pltpu.PrefetchScalarGridSpec(
                num_scalar_prefetch=0,
                grid=(M_pad // tm,),
                in_specs=[
                    pl.BlockSpec((tm, io), lambda i: (i, 0)),                     # x rows
                    _spec((io, inter), lambda i: (0, 0), single_buffer=True),     # W1 resident
                    _spec((1, inter), lambda i: (0, 0), single_buffer=True),      # b1 resident
                    _spec((inter, io), lambda i: (0, 0), single_buffer=True),     # W2 resident
                    _spec((1, io), lambda i: (0, 0), single_buffer=True),         # b2 resident
                ],
                out_specs=pl.BlockSpec((tm, io), lambda i: (i, 0)),
            ),
            compiler_params=pltpu.CompilerParams(
                dimension_semantics=("parallel",),
                vmem_limit_bytes=budget,
            ),
        )(x2d, w1, b1_2d, w2, b2_2d)
    else:
        inter_pad = _round_up(inter, tk)
        if inter_pad != inter:
            # Zero-pad the intermediate dim: GELU(0 + 0) == 0 and the padded W2 rows
            # are zero, so the output is unchanged.
            w1 = jnp.pad(w1, ((0, 0), (0, inter_pad - inter)))
            b1_2d = jnp.pad(b1_2d, ((0, 0), (0, inter_pad - inter)))
            w2 = jnp.pad(w2, ((0, inter_pad - inter), (0, 0)))

        out2d = pl.pallas_call(
            _ffn_ktiled_kernel,
            out_shape=jax.ShapeDtypeStruct((M_pad, io), dtype),
            grid_spec=pltpu.PrefetchScalarGridSpec(
                num_scalar_prefetch=0,
                grid=(M_pad // tm, inter_pad // tk),
                in_specs=[
                    pl.BlockSpec((tm, io), lambda i, k: (i, 0)),                  # x rows
                    pl.BlockSpec((io, tk), lambda i, k: (0, k)),                  # W1 k-tile
                    pl.BlockSpec((1, tk), lambda i, k: (0, k)),                   # b1 k-tile
                    pl.BlockSpec((tk, io), lambda i, k: (k, 0)),                  # W2 k-tile
                    _spec((1, io), lambda i, k: (0, 0), single_buffer=True),      # b2 const
                ],
                out_specs=pl.BlockSpec((tm, io), lambda i, k: (i, 0)),
                scratch_shapes=[pltpu.VMEM((tm, io), jnp.float32)],
            ),
            compiler_params=pltpu.CompilerParams(
                dimension_semantics=("parallel", "arbitrary"),
                vmem_limit_bytes=budget,
            ),
        )(x2d, w1, b1_2d, w2, b2_2d)

    if M_pad != M:
        out2d = out2d[:M]
    return out2d.reshape(batch, seq, io)


# ----------------------------------------------------------------------------- demo

def _init_linear(key, in_features, out_features, dtype=jnp.float32):
    """Deterministic init mimicking torch.nn.Linear bounds.
    Returns weight of shape (in_features, out_features) and bias (out_features,)."""
    kw, kb = jax.random.split(key)
    bound = 1.0 / math.sqrt(in_features)
    w = jax.random.uniform(kw, (in_features, out_features), dtype,
                           minval=-bound, maxval=bound)
    b = jax.random.uniform(kb, (out_features,), dtype,
                           minval=-bound, maxval=bound)
    return w, b


if __name__ == "__main__":
    # Small shapes consistent with forward(): (batch, sequence_length, io_features)
    batch, seq = 2, 8
    io_features = 32
    intermediate_features = 64

    key = jax.random.PRNGKey(0)
    kx, k1, k2 = jax.random.split(key, 3)

    x = jax.random.normal(kx, (batch, seq, io_features), jnp.float32)
    w1, b1 = _init_linear(k1, io_features, intermediate_features)
    w2, b2 = _init_linear(k2, intermediate_features, io_features)

    out = feed_forward(x, w1, b1, w2, b2)
    out = jax.block_until_ready(out)

    # Reference check in plain JAX (same math, no Pallas)
    h_ref = x.reshape(-1, io_features) @ w1 + b1
    h_ref = 0.5 * h_ref * (1.0 + jax.lax.erf(h_ref / math.sqrt(2.0)))
    ref = (h_ref @ w2 + b2).reshape(batch, seq, io_features)
    assert jnp.allclose(out, ref, atol=1e-5, rtol=1e-5), "mismatch vs reference"

    print("KERNEL_OK")
</pallas_src>

<mosaic_0001>
module attributes {stable_mosaic.version = 11 : i64} {
  func.func @_ffn_resident_kernel(%arg0: i32, %arg1: memref<128x32xf32, #tpu.memory_space<vmem>>, %arg2: memref<32x64xf32, #tpu.memory_space<vmem>>, %arg3: memref<1x64xf32, #tpu.memory_space<vmem>>, %arg4: memref<64x32xf32, #tpu.memory_space<vmem>>, %arg5: memref<1x32xf32, #tpu.memory_space<vmem>>, %arg6: memref<128x32xf32, #tpu.memory_space<vmem>>) attributes {dimension_semantics = [#tpu.dimension_semantics<parallel>], iteration_bounds = array<i64: 2>, scalar_prefetch = 0 : i64, scratch_operands = 0 : i64, tpu.core_type = #tpu.core_type<tc>, window_params = [{transform_indices = @transform_0, window_bounds = array<i64: 128, 32>}, {pipeline_mode = #tpu.pipeline_mode<synchronous>, transform_indices = @transform_1, window_bounds = array<i64: 32, 64>}, {pipeline_mode = #tpu.pipeline_mode<synchronous>, transform_indices = @transform_2, window_bounds = array<i64: 1, 64>}, {pipeline_mode = #tpu.pipeline_mode<synchronous>, transform_indices = @transform_3, window_bounds = array<i64: 64, 32>}, {pipeline_mode = #tpu.pipeline_mode<synchronous>, transform_indices = @transform_4, window_bounds = array<i64: 1, 32>}, {transform_indices = @transform_5, window_bounds = array<i64: 128, 32>}]} {
    %c0 = arith.constant 0 : index
    %c0_0 = arith.constant 0 : index
    %0 = vector.load %arg1[%c0, %c0_0] : memref<128x32xf32, #tpu.memory_space<vmem>>, vector<128x32xf32>
    %c0_1 = arith.constant 0 : index
    %c0_2 = arith.constant 0 : index
    %1 = vector.load %arg2[%c0_1, %c0_2] : memref<32x64xf32, #tpu.memory_space<vmem>>, vector<32x64xf32>
    %cst = arith.constant dense<0.000000e+00> : vector<128x64xf32>
    %2 = tpu.matmul %0, %1, %cst {dimension_numbers = #tpu.dot_dimension_numbers<[1], [0], [0], [1], [0, 0, 1, 1], [], []>} : vector<128x32xf32>, vector<32x64xf32>, vector<128x64xf32> -> vector<128x64xf32>
    %c0_3 = arith.constant 0 : index
    %c0_4 = arith.constant 0 : index
    %3 = vector.load %arg3[%c0_3, %c0_4] : memref<1x64xf32, #tpu.memory_space<vmem>>, vector<1x64xf32>
    %4 = vector.broadcast %3 : vector<1x64xf32> to vector<128x64xf32>
    %5 = arith.addf %2, %4 : vector<128x64xf32>
    %cst_5 = arith.constant 5.000000e-01 : f32
    %6 = vector.broadcast %cst_5 : f32 to vector<128x64xf32>
    %7 = arith.mulf %6, %5 : vector<128x64xf32>
    %cst_6 = arith.constant 0.707106769 : f32
    %8 = vector.broadcast %cst_6 : f32 to vector<128x64xf32>
    %9 = arith.mulf %5, %8 : vector<128x64xf32>
    %10 = math.erf %9 : vector<128x64xf32>
    %cst_7 = arith.constant 1.000000e+00 : f32
    %11 = vector.broadcast %cst_7 : f32 to vector<128x64xf32>
    %12 = arith.addf %11, %10 : vector<128x64xf32>
    %13 = arith.mulf %7, %12 : vector<128x64xf32>
    %c0_8 = arith.constant 0 : index
    %c0_9 = arith.constant 0 : index
    %14 = vector.load %arg4[%c0_8, %c0_9] : memref<64x32xf32, #tpu.memory_space<vmem>>, vector<64x32xf32>
    %cst_10 = arith.constant dense<0.000000e+00> : vector<128x32xf32>
    %15 = tpu.matmul %13, %14, %cst_10 {dimension_numbers = #tpu.dot_dimension_numbers<[1], [0], [0], [1], [0, 0, 1, 1], [], []>} : vector<128x64xf32>, vector<64x32xf32>, vector<128x32xf32> -> vector<128x32xf32>
    %c0_11 = arith.constant 0 : index
    %c0_12 = arith.constant 0 : index
    %16 = vector.load %arg5[%c0_11, %c0_12] : memref<1x32xf32, #tpu.memory_space<vmem>>, vector<1x32xf32>
    %17 = vector.broadcast %16 : vector<1x32xf32> to vector<128x32xf32>
    %18 = arith.addf %15, %17 : vector<128x32xf32>
    %c0_13 = arith.constant 0 : index
    %c0_14 = arith.constant 0 : index
    %19 = vector.load %arg6[%c0_13, %c0_14] : memref<128x32xf32, #tpu.memory_space<vmem>>, vector<128x32xf32>
    tpu.vector_store %arg6[%c0_13, %c0_14], %18 {strides = array<i32>} : memref<128x32xf32, #tpu.memory_space<vmem>>, vector<128x32xf32>,
    return
  }
  func.func @transform_0(%arg0: i32) -> (i32, i32) {
    %c0_i32 = arith.constant 0 : i32
    %c0_i32_0 = arith.constant 0 : i32
    return %arg0, %c0_i32 : i32, i32
  }
  func.func @transform_1(%arg0: i32) -> (i32, i32) {
    %c0_i32 = arith.constant 0 : i32
    %c0_i32_0 = arith.constant 0 : i32
    %c0_i32_1 = arith.constant 0 : i32
    return %c0_i32, %c0_i32_0 : i32, i32
  }
  func.func @transform_2(%arg0: i32) -> (i32, i32) {
    %c0_i32 = arith.constant 0 : i32
    %c0_i32_0 = arith.constant 0 : i32
    %c0_i32_1 = arith.constant 0 : i32
    return %c0_i32, %c0_i32_0 : i32, i32
  }
  func.func @transform_3(%arg0: i32) -> (i32, i32) {
    %c0_i32 = arith.constant 0 : i32
    %c0_i32_0 = arith.constant 0 : i32
    %c0_i32_1 = arith.constant 0 : i32
    return %c0_i32, %c0_i32_0 : i32, i32
  }
  func.func @transform_4(%arg0: i32) -> (i32, i32) {
    %c0_i32 = arith.constant 0 : i32
    %c0_i32_0 = arith.constant 0 : i32
    %c0_i32_1 = arith.constant 0 : i32
    return %c0_i32, %c0_i32_0 : i32, i32
  }
  func.func @transform_5(%arg0: i32) -> (i32, i32) {
    %c0_i32 = arith.constant 0 : i32
    %c0_i32_0 = arith.constant 0 : i32
    return %arg0, %c0_i32 : i32, i32
  }
}

</mosaic_0001>

<bundles_post_ra>
// kernel: tpu_custom_call.1
= control target key start
LH: loop header
LB: loop body
LE: loop exit
PB: predicated region body
PF: predicated region fallthrough
CT: control target
= control target key end

     0   :  { %s1081_s18 = smov 0   ;;  %s1261_s0 = inlined_call_operand.vmem [shape: f32[256,32], index: 0, kind: input, shape index: {}]   ;;  %s1262_s1 = inlined_call_operand.vmem [shape: f32[32,64], index: 1, kind: input, shape index: {}]   ;;  %s1263_s2 = inlined_call_operand.vmem [shape: f32[1,64], index: 2, kind: input, shape index: {}]   ;;  %s1264_s3 = inlined_call_operand.vmem [shape: f32[64,32], index: 3, kind: input, shape index: {}]   ;;  %s1265_s4 = inlined_call_operand.vmem [shape: f32[1,32], index: 4, kind: input, shape index: {}]   ;;  %s1266_s5 = inlined_call_operand.vmem [shape: f32[256,32], index: 5, kind: output, shape index: {}]  }
   0x1 LB: > { %s810_s19 = sadd.s32 4294967295, %s1049_s18   ;;  %p814_p0 = scmp.ge.s32.totalorder %s1049_s18, 1  ;;  %s1049_s18 = sphi %s1081_s18, %s15_s18  }
   0x2   : > { %p188_p1 = scmp.lt.s32.totalorder %s1049_s18, 3 }
   0x4   : > { %p189_p2 = pnand %p814_p0, %p188_p1 }
   0x5   : > { %v244_v0 = vld [vmem:[%s1262_s1] sm:$0xff] (!%p189_p2)  ;;  %v245_v1 = vld [vmem:[%s1262_s1 + $0x8] sm:$0xff] (!%p189_p2)  ;;  %v246_v2 = vld [vmem:[%s1262_s1 + $0x10] sm:$0xff] (!%p189_p2)  ;;  %s815_s26 = sshll.u32 (!%p189_p2), %s810_s19, 4  ;;  %vm255_vm0 = vcmask (!%p189_p2), 261120   ;;  %vm544_vm1 = vcmask (!%p189_p2), 523264  }
   0x6   : > { %192 = sbr.rel (%p189_p2) target bundleno = 495 (0x1ef), region = 40  ;;  %v971_v3 = vpack.c.bf16 (!%p189_p2), %v245_v1, %v244_v0  ;;  %v247_v4 = vld [vmem:[%s1262_s1 + $0x18] sm:$0xff] (!%p189_p2)  ;;  %p217_p3 = scmp.lt.s32.totalorder (!%p189_p2), %s815_s26, 31  ;;  %v529_v22 = vld [vmem:[%s1264_s3] sm:$0xff] (!%p189_p2)  ;;  %v530_v23 = vld [vmem:[%s1264_s3 + $0x8] sm:$0xff] (!%p189_p2) }
   0x7   : > { %v975_v5 = vpack.c.bf16 (!%p189_p2), %v247_v4, %v246_v2  ;;  %v979_v24 = vpack.c.bf16 (!%p189_p2), %v530_v23, %v529_v22  ;;  %v531_v25 = vld [vmem:[%s1264_s3 + $0x10] sm:$0xff] (!%p189_p2)  ;;  %v532_v26 = vld [vmem:[%s1264_s3 + $0x18] sm:$0xff] (!%p189_p2)  ;;  %v533_v28 = vld [vmem:[%s1264_s3 + $0x20] sm:$0xff] (!%p189_p2) }
   0x8   : > { %972 = vmatprep.subr.bf16.mxu0 (!%p189_p2), %v971_v3  ;;  %v983_v27 = vpack.c.bf16 (!%p189_p2), %v532_v26, %v531_v25  ;;  %v534_v29 = vld [vmem:[%s1264_s3 + $0x28] sm:$0xff] (!%p189_p2)  ;;  %v535_v31 = vld [vmem:[%s1264_s3 + $0x30] sm:$0xff] (!%p189_p2)  ;;  %v536_v32 = vld [vmem:[%s1264_s3 + $0x38] sm:$0xff] (!%p189_p2) }
   0x9   : > { %974 = vmatpush3.bf16.msra.mxu0 (!%p189_p2), %v971_v3  ;;  %995 = vmatprep.subr.bf16.mxu1 (!%p189_p2), %v979_v24  ;;  %v987_v30 = vpack.c.bf16 (!%p189_p2), %v534_v29, %v533_v28  ;;  %v991_v33 = vpack.c.bf16 (!%p189_p2), %v536_v32, %v535_v31  ;;  %v1170_v34 = vld [vmem:[%s1263_s2] ss:$0 sm:$0xff] (!%p189_p2) }
   0xa   : > { %976 = vmatprep.subr.bf16.mxu0 (!%p189_p2), %v975_v5  ;;  %999 = vmatpush3.bf16.msra.mxu1 (!%p189_p2), %v979_v24 }
   0xb   : > { %996 = vmatprep.subr.bf16.mxu1 (!%p189_p2), %v983_v27 }
   0xd   : > { %s1268_s26 = smov (!%p217_p3, %s815_s26), 31  ;;  %978 = vmatpush3.bf16.msra.mxu0 %v975_v5 }
   0xe   : > { %s816_s29 = sshll.u32 %s1268_s26, 3  ;;  %980 = vmatprep.subr.bf16.mxu0 %v979_v24  ;;  %1000 = vmatpush3.bf16.msra.mxu1 %v983_v27 }
   0xf   : > { %s1109_s7 = scalar_lea.vmem %s1261_s0, %s816_s29  ;;  %997 = vmatprep.subr.bf16.mxu1 %v987_v30  ;;  %s1224_s8 = scalar_lea.vmem %s1266_s5, %s816_s29 }
  0x10   : > { %v228_v6 = vld [vmem:[%s1109_s7] sm:$0xff]  ;;  %v229_v7 = vld [vmem:[%s1109_s7 + $0x8] sm:$0xff]  ;;  %v230_v8 = vld [vmem:[%s1109_s7 + $0x10] sm:$0xff] }
  0x11   : > { %907 = vmatprep.mubr.msk.f32.mxu0 %vm255_vm0, %v228_v6  ;;  %v231_v9 = vld [vmem:[%s1109_s7 + $0x18] sm:$0xff]  ;;  %v232_v10 = vld [vmem:[%s1109_s7 + $0x20] sm:$0xff]  ;;  %v233_v11 = vld [vmem:[%s1109_s7 + $0x28] sm:$0xff] }
  0x12   : > { %908 = vmatmul.mubr.msk.f32.vlgmr.msra.gmra.mrb[0].mxu0 %vm255_vm0, %v229_v7  ;;  %v234_v12 = vld [vmem:[%s1109_s7 + $0x30] sm:$0xff]  ;;  %v235_v13 = vld [vmem:[%s1109_s7 + $0x38] sm:$0xff]  ;;  %v236_v14 = vld [vmem:[%s1109_s7 + $0x40] sm:$0xff]  ;;  %1001 = vmatpush3.bf16.msra.mxu1 %v987_v30 }
  0x13   : > { %910 = vmatprep.mubr.msk.f32.mxu0 %vm255_vm0, %v230_v8  ;;  %v237_v15 = vld [vmem:[%s1109_s7 + $0x48] sm:$0xff]  ;;  %v238_v16 = vld [vmem:[%s1109_s7 + $0x50] sm:$0xff]  ;;  %v239_v17 = vld [vmem:[%s1109_s7 + $0x58] sm:$0xff]  ;;  %982 = vmatpush3.bf16.msra.mxu0 %v979_v24 }
  0x14   : > { %v240_v18 = vld [vmem:[%s1109_s7 + $0x60] sm:$0xff]  ;;  %v241_v19 = vld [vmem:[%s1109_s7 + $0x68] sm:$0xff]  ;;  %v242_v20 = vld [vmem:[%s1109_s7 + $0x70] sm:$0xff]  ;;  %984 = vmatprep.subr.bf16.mxu0 %v983_v27  ;;  %998 = vmatprep.subr.bf16.mxu1 %v991_v33 }
  0x15   : > { %v243_v21 = vld [vmem:[%s1109_s7 + $0x78] sm:$0xff] }
  0x16   : > { %911 = vmatmul.mubr.msk.f32.gmra.mrb[2].mxu0 %vm255_vm0, %v231_v9  ;;  %1002 = vmatpush3.bf16.msra.mxu1 %v991_v33 }
  0x17   : > { %913 = vmatprep.mubr.msk.f32.mxu0 %vm255_vm0, %v232_v10  ;;  %986 = vmatpush3.bf16.msra.mxu0 %v983_v27 }
  0x18   : > { %988 = vmatprep.subr.bf16.mxu0 %v987_v30 }
  0x1a   : > { %914 = vmatmul.mubr.msk.f32.gmra.mrb[4].mxu0 %vm255_vm0, %v233_v11 }
  0x1b   : > { %916 = vmatprep.mubr.msk.f32.mxu0 %vm255_vm0, %v234_v12  ;;  %990 = vmatpush3.bf16.msra.mxu0 %v987_v30 }
  0x1c   : > { %992 = vmatprep.subr.bf16.mxu0 %v991_v33 }
  0x1e   : > { %917 = vmatmul.mubr.msk.f32.gmra.mrb[6].mxu0 %vm255_vm0, %v235_v13 }
  0x1f   : > { %919 = vmatprep.mubr.msk.f32.mxu0 %vm255_vm0, %v236_v14  ;;  %994 = vmatpush3.bf16.msra.mxu0 %v991_v33 }
  0x22   : > { %920 = vmatmul.mubr.msk.f32.gmra.mrb[8].mxu0 %vm255_vm0, %v237_v15 }
  0x23   : > { %922 = vmatprep.mubr.msk.f32.mxu0 %vm255_vm0, %v238_v16 }
  0x26   : > { %923 = vmatmul.mubr.msk.f32.gmra.mrb[10].mxu0 %vm255_vm0, %v239_v17 }
  0x27   : > { %925 = vmatprep.mubr.msk.f32.mxu0 %vm255_vm0, %v240_v18 }
  0x2a   : > { %926 = vmatmul.mubr.msk.f32.gmra.mrb[12].mxu0 %vm255_vm0, %v241_v19 }
  0x2b   : > { %928 = vmatprep.mubr.msk.f32.mxu0 %vm255_vm0, %v242_v20 }
  0x2e   : > { %929 = vmatmul.mubr.msk.f32.gmra.mrb[14].mxu0 %vm255_vm0, %v243_v21 }
  0xe5   : > { %v909_v35 = vpop.f32.mrb[0].mxu0 }
  0xe6   : > { %v376_v36 = vadd.f32 %v909_v35, %v1170_v34  ;;  %v370_v37 = vpop.f32.mrb[1].mxu0 }
  0xe7   : > { %v371_v38 = vadd.f32 %v1170_v34, %v370_v37 }
  0xe8   : > { %v466_v39 = vmul.f32 0.70710677, %v376_v36  ;;  %v450_v3 = vmul.f32 0.5, %v376_v36 }
  0xe9   : > { %v465_v40 = vmul.f32 0.70710677, %v371_v38  ;;  %v912_v41 = vpop.f32.mrb[2].mxu0  ;;  %v449_v63 = vmul.f32 0.5, %v371_v38 }
  0xea   : > { %1011 = verf.f32 %v466_v39  ;;  %v386_v42 = vadd.f32 %v912_v41, %v1170_v34  ;;  %v380_v43 = vpop.f32.mrb[3].mxu0 }
  0xeb   : > { %1013 = verf.f32 %v465_v40  ;;  %v381_v44 = vadd.f32 %v1170_v34, %v380_v43 }
  0xec   : > { %v468_v45 = vmul.f32 0.70710677, %v386_v42  ;;  %v452_v17 = vmul.f32 0.5, %v386_v42 }
  0xed   : > { %v467_v46 = vmul.f32 0.70710677, %v381_v44  ;;  %v915_v47 = vpop.f32.mrb[4].mxu0  ;;  %v451_v13 = vmul.f32 0.5, %v381_v44 }
  0xee   : > { %1015 = verf.f32 %v468_v45  ;;  %v396_v48 = vadd.f32 %v915_v47, %v1170_v34  ;;  %v390_v49 = vpop.f32.mrb[5].mxu0 }
  0xef   : > { %1017 = verf.f32 %v467_v46  ;;  %v391_v50 = vadd.f32 %v1170_v34, %v390_v49 }
  0xf0   : > { %v470_v51 = vmul.f32 0.70710677, %v396_v48  ;;  %v454_v31 = vmul.f32 0.5, %v396_v48 }
  0xf1   : > { %v469_v52 = vmul.f32 0.70710677, %v391_v50  ;;  %v918_v53 = vpop.f32.mrb[6].mxu0  ;;  %v453_v27 = vmul.f32 0.5, %v391_v50 }
  0xf2   : > { %1019 = verf.f32 %v470_v51  ;;  %v1179_v54 = vadd.f32 %v918_v53, %v1170_v34  ;;  %v400_v55 = vpop.f32.mrb[7].mxu0 }
  0xf3   : > { %1021 = verf.f32 %v469_v52  ;;  %v401_v56 = vadd.f32 %v1170_v34, %v400_v55 }
  0xf4   : > { %v1012_v57 = vpop.eup %1011  ;;  %v472_v58 = vmul.f32 0.70710677, %v1179_v54  ;;  %v456_v46 = vmul.f32 0.5, %v1179_v54 }
  0xf5   : > { %v1014_v59 = vpop.eup %1013  ;;  %v498_v60 = vadd.f32 1.0, %v1012_v57  ;;  %v471_v61 = vmul.f32 0.70710677, %v401_v56  ;;  %v921_v62 = vpop.f32.mrb[8].mxu0  ;;  %v455_v42 = vmul.f32 0.5, %v401_v56 }
  0xf6   : > { %v497_v0 = vadd.f32 1.0, %v1014_v59  ;;  %1023 = verf.f32 %v472_v58  ;;  %v1184_v1 = vadd.f32 %v921_v62, %v1170_v34  ;;  %v410_v2 = vpop.f32.mrb[9].mxu0 }
  0xf7   : > { %1025 = verf.f32 %v471_v61  ;;  %v411_v4 = vadd.f32 %v1170_v34, %v410_v2  ;;  %v514_v9 = vmul.f32 %v498_v60, %v450_v3 }
  0xf8   : > { %v1016_v5 = vpop.eup %1015  ;;  %v513_v6 = vmul.f32 %v497_v0, %v449_v63  ;;  %v474_v7 = vmul.f32 0.70710677, %v1184_v1  ;;  %v458_v58 = vmul.f32 0.5, %v1184_v1 }
  0xf9   : > { %v1018_v8 = vpop.eup %1017  ;;  %v500_v10 = vadd.f32 1.0, %v1016_v5  ;;  %v473_v11 = vmul.f32 0.70710677, %v411_v4  ;;  %v924_v12 = vpop.f32.mrb[10].mxu0  ;;  %v457_v56 = vmul.f32 0.5, %v411_v4 }
  0xfa   : > { %1027 = verf.f32 %v474_v7  ;;  %v1189_v14 = vadd.f32 %v924_v12, %v1170_v34  ;;  %v420_v15 = vpop.f32.mrb[11].mxu0  ;;  %947 = vmatprep.mubr.msk.f32.mxu0 %vm544_vm1, %v513_v6  ;;  %v499_v16 = vadd.f32 1.0, %v1018_v8 }
  0xfb   : > { %1029 = verf.f32 %v473_v11  ;;  %v421_v18 = vadd.f32 %v1170_v34, %v420_v15  ;;  %948 = vmatmul.mubr.msk.f32.vlgmr.msra.gmra.mrb[16].mxu0 %vm544_vm1, %v514_v9  ;;  %v516_v23 = vmul.f32 %v500_v10, %v452_v17 }
  0xfc   : > { %v1020_v19 = vpop.eup %1019  ;;  %v476_v20 = vmul.f32 0.70710677, %v1189_v14  ;;  %v515_v21 = vmul.f32 %v499_v16, %v451_v13  ;;  %v460_v0 = vmul.f32 0.5, %v1189_v14 }
  0xfd   : > { %v1022_v22 = vpop.eup %1021  ;;  %v502_v24 = vadd.f32 1.0, %v1020_v19  ;;  %v475_v25 = vmul.f32 0.70710677, %v421_v18  ;;  %v927_v26 = vpop.f32.mrb[12].mxu0  ;;  %v459_v62 = vmul.f32 0.5, %v421_v18 }
  0xfe   : > { %v501_v28 = vadd.f32 1.0, %v1022_v22  ;;  %1031 = verf.f32 %v476_v20  ;;  %v436_v29 = vadd.f32 %v927_v26, %v1170_v34  ;;  %v430_v30 = vpop.f32.mrb[13].mxu0  ;;  %950 = vmatprep.mubr.msk.f32.mxu1 %vm544_vm1, %v515_v21  ;;  %v836_v19 = vld [vmem:[%s1265_s4] ss:$0 sm:$0xff] }
  0xff   : > { %1033 = verf.f32 %v475_v25  ;;  %v431_v32 = vadd.f32 %v1170_v34, %v430_v30  ;;  %951 = vmatmul.mubr.msk.f32.vlgmr.msra.gmra.mrb[0].mxu1 %vm544_vm1, %v516_v23  ;;  %v518_v38 = vmul.f32 %v502_v24, %v454_v31 }
 0x100   : > { %v1024_v33 = vpop.eup %1023  ;;  %v517_v35 = vmul.f32 %v501_v28, %v453_v27  ;;  %v478_v36 = vmul.f32 0.70710677, %v436_v29  ;;  %v462_v8 = vmul.f32 0.5, %v436_v29 }
 0x101   : > { %v1026_v37 = vpop.eup %1025  ;;  %v504_v39 = vadd.f32 1.0, %v1024_v33  ;;  %v477_v40 = vmul.f32 0.70710677, %v431_v32  ;;  %v930_v41 = vpop.f32.mrb[14].mxu0  ;;  %v461_v6 = vmul.f32 0.5, %v431_v32 }
 0x102   : > { %v503_v43 = vadd.f32 1.0, %v1026_v37  ;;  %1035 = verf.f32 %v478_v36  ;;  %v446_v44 = vadd.f32 %v930_v41, %v1170_v34  ;;  %v440_v45 = vpop.f32.mrb[15].mxu0  ;;  %953 = vmatprep.mubr.msk.f32.mxu1 %vm544_vm1, %v517_v35 }
 0x103   : > { %1037 = verf.f32 %v477_v40  ;;  %v441_v47 = vadd.f32 %v1170_v34, %v440_v45  ;;  %954 = vmatmul.mubr.msk.f32.gmra.mrb[2].mxu1 %vm544_vm1, %v518_v38  ;;  %v520_v52 = vmul.f32 %v504_v39, %v456_v46 }
 0x104   : > { %v1028_v48 = vpop.eup %1027  ;;  %v519_v49 = vmul.f32 %v503_v43, %v455_v42  ;;  %v480_v50 = vmul.f32 0.70710677, %v446_v44  ;;  %v464_v16 = vmul.f32 0.5, %v446_v44 }
 0x105   : > { %v1030_v51 = vpop.eup %1029  ;;  %v506_v53 = vadd.f32 1.0, %v1028_v48  ;;  %v479_v55 = vmul.f32 0.70710677, %v441_v47  ;;  %v463_v14 = vmul.f32 0.5, %v441_v47 }
 0x106   : > { %v505_v57 = vadd.f32 1.0, %v1030_v51  ;;  %1039 = verf.f32 %v480_v50  ;;  %956 = vmatprep.mubr.msk.f32.mxu1 %vm544_vm1, %v519_v49 }
 0x107   : > { %1041 = verf.f32 %v479_v55  ;;  %957 = vmatmul.mubr.msk.f32.gmra.mrb[4].mxu1 %vm544_vm1, %v520_v52  ;;  %v522_v60 = vmul.f32 %v506_v53, %v458_v58 }
 0x108   : > { %v1032_v34 = vpop.eup %1031  ;;  %v521_v54 = vmul.f32 %v505_v57, %v457_v56 }
 0x109   : > { %v1034_v59 = vpop.eup %1033  ;;  %v508_v61 = vadd.f32 1.0, %v1032_v34 }
 0x10a   : > { %v507_v63 = vadd.f32 1.0, %v1034_v59  ;;  %959 = vmatprep.mubr.msk.f32.mxu1 %vm544_vm1, %v521_v54 }
 0x10b   : > { %960 = vmatmul.mubr.msk.f32.gmra.mrb[6].mxu1 %vm544_vm1, %v522_v60  ;;  %v524_v1 = vmul.f32 %v508_v61, %v460_v0 }
 0x10c   : > { %v1036_v2 = vpop.eup %1035  ;;  %v523_v3 = vmul.f32 %v507_v63, %v459_v62 }
 0x10d   : > { %v1038_v4 = vpop.eup %1037  ;;  %v510_v5 = vadd.f32 1.0, %v1036_v2 }
 0x10e   : > { %v509_v7 = vadd.f32 1.0, %v1038_v4  ;;  %962 = vmatprep.mubr.msk.f32.mxu1 %vm544_vm1, %v523_v3 }
 0x10f   : > { %963 = vmatmul.mubr.msk.f32.gmra.mrb[8].mxu1 %vm544_vm1, %v524_v1  ;;  %v526_v12 = vmul.f32 %v510_v5, %v462_v8 }
 0x110   : > { %v1040_v9 = vpop.eup %1039  ;;  %v525_v10 = vmul.f32 %v509_v7, %v461_v6 }
 0x111   : > { %v1042_v11 = vpop.eup %1041  ;;  %v512_v13 = vadd.f32 1.0, %v1040_v9 }
 0x112   : > { %v511_v15 = vadd.f32 1.0, %v1042_v11  ;;  %965 = vmatprep.mubr.msk.f32.mxu1 %vm544_vm1, %v525_v10 }
 0x113   : > { %966 = vmatmul.mubr.msk.f32.gmra.mrb[10].mxu1 %vm544_vm1, %v526_v12  ;;  %v528_v18 = vmul.f32 %v512_v13, %v464_v16 }
 0x114   : > { %v527_v17 = vmul.f32 %v511_v15, %v463_v14 }
 0x116   : > { %968 = vmatprep.mubr.msk.f32.mxu1 %vm544_vm1, %v527_v17 }
 0x117   : > { %969 = vmatmul.mubr.msk.f32.gmra.mrb[12].mxu1 %vm544_vm1, %v528_v18 }
 0x1ce   : > { %v949_v20 = vpop.f32.mrb[16].mxu0 }
 0x1cf   : > { %v665_v21 = vadd.f32 %v949_v20, %v836_v19  ;;  %v659_v22 = vpop.f32.mrb[17].mxu0 }
 0x1d0   : > { %v660_v23 = vadd.f32 %v836_v19, %v659_v22 }
 0x1d1   : > { %739 = vst.msk [vmem:[%s1224_s8 + $0x8] sm:$0xff] %vm255_vm0, %v665_v21 }
 0x1d2   : > { %738 = vst.msk [vmem:[%s1224_s8] sm:$0xff] %vm255_vm0, %v660_v23  ;;  %v952_v24 = vpop.f32.mrb[0].mxu1 }
 0x1d3   : > { %v675_v25 = vadd.f32 %v952_v24, %v836_v19  ;;  %v669_v26 = vpop.f32.mrb[1].mxu1 }
 0x1d4   : > { %v670_v27 = vadd.f32 %v836_v19, %v669_v26 }
 0x1d5   : > { %741 = vst.msk [vmem:[%s1224_s8 + $0x18] sm:$0xff] %vm255_vm0, %v675_v25 }
 0x1d6   : > { %740 = vst.msk [vmem:[%s1224_s8 + $0x10] sm:$0xff] %vm255_vm0, %v670_v27  ;;  %v955_v28 = vpop.f32.mrb[2].mxu1 }
 0x1d7   : > { %v685_v29 = vadd.f32 %v955_v28, %v836_v19  ;;  %v679_v30 = vpop.f32.mrb[3].mxu1 }
 0x1d8   : > { %v680_v31 = vadd.f32 %v836_v19, %v679_v30 }
 0x1d9   : > { %743 = vst.msk [vmem:[%s1224_s8 + $0x28] sm:$0xff] %vm255_vm0, %v685_v29 }
 0x1da   : > { %742 = vst.msk [vmem:[%s1224_s8 + $0x20] sm:$0xff] %vm255_vm0, %v680_v31  ;;  %v958_v32 = vpop.f32.mrb[4].mxu1 }
 0x1db   : > { %v695_v33 = vadd.f32 %v958_v32, %v836_v19  ;;  %v689_v35 = vpop.f32.mrb[5].mxu1 }
 0x1dc   : > { %v690_v36 = vadd.f32 %v836_v19, %v689_v35 }
 0x1dd   : > { %745 = vst.msk [vmem:[%s1224_s8 + $0x38] sm:$0xff] %vm255_vm0, %v695_v33 }
 0x1de   : > { %744 = vst.msk [vmem:[%s1224_s8 + $0x30] sm:$0xff] %vm255_vm0, %v690_v36  ;;  %v961_v37 = vpop.f32.mrb[6].mxu1 }
 0x1df   : > { %v705_v38 = vadd.f32 %v961_v37, %v836_v19  ;;  %v699_v39 = vpop.f32.mrb[7].mxu1 }
 0x1e0   : > { %v700_v40 = vadd.f32 %v836_v19, %v699_v39 }
 0x1e1   : > { %747 = vst.msk [vmem:[%s1224_s8 + $0x48] sm:$0xff] %vm255_vm0, %v705_v38 }
 0x1e2   : > { %746 = vst.msk [vmem:[%s1224_s8 + $0x40] sm:$0xff] %vm255_vm0, %v700_v40  ;;  %v964_v41 = vpop.f32.mrb[8].mxu1 }
 0x1e3   : > { %v715_v42 = vadd.f32 %v964_v41, %v836_v19  ;;  %v709_v43 = vpop.f32.mrb[9].mxu1 }
 0x1e4   : > { %v710_v44 = vadd.f32 %v836_v19, %v709_v43 }
 0x1e5   : > { %749 = vst.msk [vmem:[%s1224_s8 + $0x58] sm:$0xff] %vm255_vm0, %v715_v42 }
 0x1e6   : > { %748 = vst.msk [vmem:[%s1224_s8 + $0x50] sm:$0xff] %vm255_vm0, %v710_v44  ;;  %v967_v45 = vpop.f32.mrb[10].mxu1 }
 0x1e7   : > { %v725_v46 = vadd.f32 %v967_v45, %v836_v19  ;;  %v719_v47 = vpop.f32.mrb[11].mxu1 }
 0x1e8   : > { %v720_v48 = vadd.f32 %v836_v19, %v719_v47 }
 0x1e9   : > { %751 = vst.msk [vmem:[%s1224_s8 + $0x68] sm:$0xff] %vm255_vm0, %v725_v46 }
 0x1ea   : > { %750 = vst.msk [vmem:[%s1224_s8 + $0x60] sm:$0xff] %vm255_vm0, %v720_v48  ;;  %v970_v49 = vpop.f32.mrb[12].mxu1 }
 0x1eb   : > { %v735_v50 = vadd.f32 %v970_v49, %v836_v19  ;;  %v729_v51 = vpop.f32.mrb[13].mxu1 }
 0x1ec   : > { %v730_v52 = vadd.f32 %v836_v19, %v729_v51 }
 0x1ed   : > { %753 = vst.msk [vmem:[%s1224_s8 + $0x78] sm:$0xff] %vm255_vm0, %v735_v50 }
 0x1ee   : > { %752 = vst.msk [vmem:[%s1224_s8 + $0x70] sm:$0xff] %vm255_vm0, %v730_v52 }
 0x1ef PF: > { %s15_s18 = sadd.s32 1, %s1049_s18  }
 0x1f0   : > { %p12_p4 = scmp.ge.s32.totalorder %s15_s18, 4  }
 0x1f2   :  { %14 = sbr.rel (!%p12_p4) target bundleno = 1 (0x1), region = 70 }

</bundles_post_ra>
